<compile_context>
chip_gen: v7x
topology: tpu7x:2x2x1
jax: 0.10.0
libtpu: 0.0.40
codegen_flags: <defaults>
</compile_context>

<pallas_src>
import math

import jax
import jax.numpy as jnp
from jax.experimental import pallas as pl
from jax.experimental.pallas import tpu as pltpu

ACTION_DIM = 2            # matches action_bound = [0.5, 0.3]
HEAD_HALF = 64            # fused head: mean -> lanes [0:64), log_std -> [64:128)
OBV_DIM = 512             # ResNet feature size implied by fc: 1024 - 2*256
SCALAR_EMB = 512          # two Linear(1,256) embeddings, packed side by side
FEAT_DIM = OBV_DIM + SCALAR_EMB   # 1024 (fc input)
HIDDEN = 128
DEPTH_FEAT = 1 * 16 * 16
LEAKY_SLOPE = 0.01        # F.leaky_relu default
LOG_SQRT_2PI = 0.5 * math.log(2.0 * math.pi)


def actor_kernel(depth_ref, scalars_ref, eps_ref,
                 wfeat_ref, bfeat_ref,
                 w12_ref, b12_ref,
                 wfc_ref, bfc_ref,
                 wfc1_ref, bfc1_ref,
                 whead_ref, bhead_ref,
                 bound_ref,
                 out_ref):
    f32 = jnp.float32
    bf16 = jnp.bfloat16

    # --- feature extractor for depth -----------------------------------------
    # TODO(synk): ResNet(ResBlock) is not defined in the provided source; use a
    # deterministic Linear(flattened depth -> 512) + ReLU stand-in producing the
    # 512 features implied by fc's 1024-dim input (512 + 256 + 256).
    obv = jnp.dot(depth_ref[...], wfeat_ref[...], preferred_element_type=f32)
    obv = jnp.maximum(obv + bfeat_ref[...], 0.0)                      # (B, 512)

    # --- both Linear(1, 256) scalar embeddings in one MXU dot -----------------
    # w12 is (2, 512) block-diagonal: row 0 holds lin1 weights in lanes [0:256),
    # row 1 holds lin2 weights in lanes [256:512), so the dot yields [e1 | e2]
    # with no cross-lane broadcasts.
    e12 = jnp.dot(scalars_ref[...], w12_ref[...], preferred_element_type=f32)
    e12 = e12 + b12_ref[...]
    e12 = jnp.where(e12 >= 0.0, e12, LEAKY_SLOPE * e12)               # (B, 512)

    # --- trunk: fc as two partial dots on static wfc slices (no concat) -------
    x = (jnp.dot(obv.astype(bf16), wfc_ref[0:OBV_DIM, :],
                 preferred_element_type=f32)
         + jnp.dot(e12.astype(bf16), wfc_ref[OBV_DIM:FEAT_DIM, :],
                   preferred_element_type=f32)
         + bfc_ref[...])
    x = jnp.maximum(x, 0.0)                                           # (B, 128)
    x = jnp.dot(x.astype(bf16), wfc1_ref[...],
                preferred_element_type=f32) + bfc1_ref[...]
    x = jnp.maximum(x, 0.0)                                           # (B, 128)

    # --- fused mean / log_std heads: one 128-wide matmul ----------------------
    h = jnp.dot(x.astype(bf16), whead_ref[...],
                preferred_element_type=f32) + bhead_ref[...]          # (B, 128)
    mean = h[:, :HEAD_HALF]                                           # (B, 64)
    pre_std = h[:, HEAD_HALF:]                                        # (B, 64)
    # softplus (numerically stable); the module uses its output directly as the
    # Normal scale.
    std = jnp.maximum(pre_std, 0.0) + jnp.log1p(jnp.exp(-jnp.abs(pre_std)))

    # --- reparameterized sample + log_prob ------------------------------------
    eps = eps_ref[...]                                                # (B, 64)
    z = mean + std * eps                                   # dist.rsample()
    logp = -0.5 * eps * eps - jnp.log(std) - LOG_SQRT_2PI  # dist.log_prob(z)
    a = jnp.tanh(z)
    # NOTE: the reference applies tanh *again* inside the correction term
    # (torch.tanh(action)); reproduce that exactly.
    ta = jnp.tanh(a)
    logp = logp - jnp.log(1.0 - ta * ta + 1e-07)

    # Single lane-dense (B, 128) store: scaled action in lanes [0:64),
    # log_prob in lanes [64:128).
    out_ref[...] = jnp.concatenate([a * bound_ref[...], logp], axis=1)


def make_params(key):
    """Deterministic parameters with PyTorch-default Linear init shapes."""
    def linear(k, fan_in, fan_out):
        k1, k2 = jax.random.split(k)
        bound = 1.0 / math.sqrt(fan_in)
        w = jax.random.uniform(k1, (fan_in, fan_out), jnp.float32, -bound, bound)
        b = jax.random.uniform(k2, (1, fan_out), jnp.float32, -bound, bound)
        return w, b

    k_feat, k1, k2, kfc, kfc1, km, ks = jax.random.split(key, 7)
    wfeat, bfeat = linear(k_feat, DEPTH_FEAT, OBV_DIM)   # ResNet stand-in
    w1, b1 = linear(k1, 1, 256)                          # lin1
    w2, b2 = linear(k2, 1, 256)                          # lin2
    wfc, bfc = linear(kfc, FEAT_DIM, HIDDEN)             # fc
    wfc1, bfc1 = linear(kfc1, HIDDEN, HIDDEN)            # fc1
    wm, bm = linear(km, HIDDEN, ACTION_DIM)              # mean_layer
    ws, bs = linear(ks, HIDDEN, ACTION_DIM)              # log_std_layer

    # Pack the two Linear(1,256) layers into one (2, 512) block-diagonal weight
    # so both embeddings come out of a single dot with no lane broadcasts.
    w12 = (jnp.zeros((2, SCALAR_EMB), jnp.float32)
           .at[0, :256].set(w1[0])
           .at[1, 256:].set(w2[0]))
    b12 = jnp.concatenate([b1, b2], axis=1)              # (1, 512)

    # Fuse the two tiny heads into one (128, 128) weight: mean head in lanes
    # [0:64) (real columns 0..1), log_std head in lanes [64:128) (64..65).
    whead = (jnp.zeros((HIDDEN, 2 * HEAD_HALF), jnp.float32)
             .at[:, :ACTION_DIM].set(wm)
             .at[:, HEAD_HALF:HEAD_HALF + ACTION_DIM].set(ws))
    bhead = (jnp.zeros((1, 2 * HEAD_HALF), jnp.float32)
             .at[:, :ACTION_DIM].set(bm)
             .at[:, HEAD_HALF:HEAD_HALF + ACTION_DIM].set(bs))

    bound = jnp.zeros((1, HEAD_HALF), jnp.float32).at[0, :ACTION_DIM].set(
        jnp.array([0.5, 0.3], jnp.float32))

    # Large weights in bf16 (halves weight HBM->VMEM DMA); biases stay f32 and
    # all elementwise math is f32 (v5e has no bf16 VPU/EUP).
    bf16 = jnp.bfloat16
    return (wfeat.astype(bf16), bfeat,
            w12, b12,
            wfc.astype(bf16), bfc,
            wfc1.astype(bf16), bfc1,
            whead.astype(bf16), bhead,
            bound)


def actor_forward(params, depth, local_goal_point, angle, eps):
    # TODO(synk): at B=2 the call is dominated by ~0.6 MB of weight DMA plus
    # launch latency; batch many env steps per call (and add a batch grid axis
    # with dimension_semantics=("parallel",) to use the 2nd TC on v7x) or
    # prefetch weights cross-call to amortize it.
    B = depth.shape[0]
    depth_flat = depth.astype(jnp.bfloat16).reshape(B, -1)         # (B, 256)
    scalars = jnp.stack(
        [local_goal_point.astype(jnp.float32).reshape(-1),
         angle.astype(jnp.float32).reshape(-1)], axis=1)           # (B, 2)

    vmem = pl.BlockSpec(memory_space=pltpu.MemorySpace.VMEM)
    n_inputs = 3 + len(params)

    out = pl.pallas_call(
        actor_kernel,
        out_shape=jax.ShapeDtypeStruct((B, 2 * HEAD_HALF), jnp.float32),
        in_specs=[vmem] * n_inputs,
        out_specs=vmem,
    )(depth_flat, scalars, eps, *params)

    action = out[:, :ACTION_DIM]
    log_prob = out[:, HEAD_HALF:HEAD_HALF + ACTION_DIM]
    return action, log_prob


if __name__ == "__main__":
    key = jax.random.PRNGKey(0)
    k_params, k_depth, k_goal, k_angle, k_eps = jax.random.split(key, 5)

    params = make_params(k_params)

    B = 2
    depth = jax.random.normal(k_depth, (B, 1, 16, 16), jnp.float32)   # NCHW
    local_goal_point = jax.random.normal(k_goal, (B,), jnp.float32)
    angle = jax.random.normal(k_angle, (B,), jnp.float32)
    # rsample noise (generated here so the kernel stays deterministic).
    eps = jax.random.normal(k_eps, (B, HEAD_HALF), jnp.float32)

    action, log_prob = actor_forward(params, depth, local_goal_point, angle, eps)
    jax.block_until_ready((action, log_prob))

    assert action.shape == (B, ACTION_DIM)
    assert log_prob.shape == (B, ACTION_DIM)
    assert bool(jnp.all(jnp.isfinite(action))) and bool(jnp.all(jnp.isfinite(log_prob)))
    print("KERNEL_OK")
</pallas_src>

<mosaic_0001>
module attributes {stable_mosaic.version = 11 : i64} {
  func.func @actor_kernel(%arg0: memref<2x256xbf16, #tpu.memory_space<vmem>>, %arg1: memref<2x2xf32, #tpu.memory_space<vmem>>, %arg2: memref<2x64xf32, #tpu.memory_space<vmem>>, %arg3: memref<256x512xbf16, #tpu.memory_space<vmem>>, %arg4: memref<1x512xf32, #tpu.memory_space<vmem>>, %arg5: memref<2x512xf32, #tpu.memory_space<vmem>>, %arg6: memref<1x512xf32, #tpu.memory_space<vmem>>, %arg7: memref<1024x128xbf16, #tpu.memory_space<vmem>>, %arg8: memref<1x128xf32, #tpu.memory_space<vmem>>, %arg9: memref<128x128xbf16, #tpu.memory_space<vmem>>, %arg10: memref<1x128xf32, #tpu.memory_space<vmem>>, %arg11: memref<128x128xbf16, #tpu.memory_space<vmem>>, %arg12: memref<1x128xf32, #tpu.memory_space<vmem>>, %arg13: memref<1x64xf32, #tpu.memory_space<vmem>>, %arg14: memref<2x128xf32, #tpu.memory_space<vmem>>) attributes {dimension_semantics = [], scalar_prefetch = 0 : i64, scratch_operands = 0 : i64, tpu.core_type = #tpu.core_type<tc>} {
    %c0 = arith.constant 0 : index
    %c0_0 = arith.constant 0 : index
    %0 = vector.load %arg0[%c0, %c0_0] : memref<2x256xbf16, #tpu.memory_space<vmem>>, vector<2x256xbf16>
    %c0_1 = arith.constant 0 : index
    %c0_2 = arith.constant 0 : index
    %1 = vector.load %arg3[%c0_1, %c0_2] : memref<256x512xbf16, #tpu.memory_space<vmem>>, vector<256x512xbf16>
    %cst = arith.constant dense<0.000000e+00> : vector<2x512xf32>
    %2 = tpu.matmul %0, %1, %cst {dimension_numbers = #tpu.dot_dimension_numbers<[1], [0], [0], [1], [0, 0, 1, 1], [], []>} : vector<2x256xbf16>, vector<256x512xbf16>, vector<2x512xf32> -> vector<2x512xf32>
    %c0_3 = arith.constant 0 : index
    %c0_4 = arith.constant 0 : index
    %3 = vector.load %arg4[%c0_3, %c0_4] : memref<1x512xf32, #tpu.memory_space<vmem>>, vector<1x512xf32>
    %4 = vector.broadcast %3 : vector<1x512xf32> to vector<2x512xf32>
    %5 = arith.addf %2, %4 : vector<2x512xf32>
    %cst_5 = arith.constant 0.000000e+00 : f32
    %6 = vector.broadcast %cst_5 : f32 to vector<2x512xf32>
    %7 = arith.maximumf %5, %6 : vector<2x512xf32>
    %c0_6 = arith.constant 0 : index
    %c0_7 = arith.constant 0 : index
    %8 = vector.load %arg1[%c0_6, %c0_7] : memref<2x2xf32, #tpu.memory_space<vmem>>, vector<2x2xf32>
    %c0_8 = arith.constant 0 : index
    %c0_9 = arith.constant 0 : index
    %9 = vector.load %arg5[%c0_8, %c0_9] : memref<2x512xf32, #tpu.memory_space<vmem>>, vector<2x512xf32>
    %cst_10 = arith.constant dense<0.000000e+00> : vector<2x512xf32>
    %10 = tpu.matmul %8, %9, %cst_10 {dimension_numbers = #tpu.dot_dimension_numbers<[1], [0], [0], [1], [0, 0, 1, 1], [], []>} : vector<2x2xf32>, vector<2x512xf32>, vector<2x512xf32> -> vector<2x512xf32>
    %c0_11 = arith.constant 0 : index
    %c0_12 = arith.constant 0 : index
    %11 = vector.load %arg6[%c0_11, %c0_12] : memref<1x512xf32, #tpu.memory_space<vmem>>, vector<1x512xf32>
    %12 = vector.broadcast %11 : vector<1x512xf32> to vector<2x512xf32>
    %13 = arith.addf %10, %12 : vector<2x512xf32>
    %cst_13 = arith.constant 0.000000e+00 : f32
    %14 = vector.broadcast %cst_13 : f32 to vector<2x512xf32>
    %15 = arith.cmpf oge, %13, %14 : vector<2x512xf32>
    %cst_14 = arith.constant 0.00999999977 : f32
    %16 = vector.broadcast %cst_14 : f32 to vector<2x512xf32>
    %17 = arith.mulf %16, %13 : vector<2x512xf32>
    %18 = arith.select %15, %13, %17 : vector<2x512xi1>, vector<2x512xf32>
    %19 = arith.truncf %7 : vector<2x512xf32> to vector<2x512xbf16>
    %c0_15 = arith.constant 0 : index
    %c0_16 = arith.constant 0 : index
    %20 = vector.load %arg7[%c0_15, %c0_16] : memref<1024x128xbf16, #tpu.memory_space<vmem>>, vector<512x128xbf16>
    %cst_17 = arith.constant dense<0.000000e+00> : vector<2x128xf32>
    %21 = tpu.matmul %19, %20, %cst_17 {dimension_numbers = #tpu.dot_dimension_numbers<[1], [0], [0], [1], [0, 0, 1, 1], [], []>} : vector<2x512xbf16>, vector<512x128xbf16>, vector<2x128xf32> -> vector<2x128xf32>
    %22 = arith.truncf %18 : vector<2x512xf32> to vector<2x512xbf16>
    %c512 = arith.constant 512 : index
    %c0_18 = arith.constant 0 : index
    %23 = vector.load %arg7[%c512, %c0_18] : memref<1024x128xbf16, #tpu.memory_space<vmem>>, vector<512x128xbf16>
    %cst_19 = arith.constant dense<0.000000e+00> : vector<2x128xf32>
    %24 = tpu.matmul %22, %23, %cst_19 {dimension_numbers = #tpu.dot_dimension_numbers<[1], [0], [0], [1], [0, 0, 1, 1], [], []>} : vector<2x512xbf16>, vector<512x128xbf16>, vector<2x128xf32> -> vector<2x128xf32>
    %25 = arith.addf %21, %24 : vector<2x128xf32>
    %c0_20 = arith.constant 0 : index
    %c0_21 = arith.constant 0 : index
    %26 = vector.load %arg8[%c0_20, %c0_21] : memref<1x128xf32, #tpu.memory_space<vmem>>, vector<1x128xf32>
    %27 = vector.broadcast %26 : vector<1x128xf32> to vector<2x128xf32>
    %28 = arith.addf %25, %27 : vector<2x128xf32>
    %cst_22 = arith.constant 0.000000e+00 : f32
    %29 = vector.broadcast %cst_22 : f32 to vector<2x128xf32>
    %30 = arith.maximumf %28, %29 : vector<2x128xf32>
    %31 = arith.truncf %30 : vector<2x128xf32> to vector<2x128xbf16>
    %c0_23 = arith.constant 0 : index
    %c0_24 = arith.constant 0 : index
    %32 = vector.load %arg9[%c0_23, %c0_24] : memref<128x128xbf16, #tpu.memory_space<vmem>>, vector<128x128xbf16>
    %cst_25 = arith.constant dense<0.000000e+00> : vector<2x128xf32>
    %33 = tpu.matmul %31, %32, %cst_25 {dimension_numbers = #tpu.dot_dimension_numbers<[1], [0], [0], [1], [0, 0, 1, 1], [], []>} : vector<2x128xbf16>, vector<128x128xbf16>, vector<2x128xf32> -> vector<2x128xf32>
    %c0_26 = arith.constant 0 : index
    %c0_27 = arith.constant 0 : index
    %34 = vector.load %arg10[%c0_26, %c0_27] : memref<1x128xf32, #tpu.memory_space<vmem>>, vector<1x128xf32>
    %35 = vector.broadcast %34 : vector<1x128xf32> to vector<2x128xf32>
    %36 = arith.addf %33, %35 : vector<2x128xf32>
    %cst_28 = arith.constant 0.000000e+00 : f32
    %37 = vector.broadcast %cst_28 : f32 to vector<2x128xf32>
    %38 = arith.maximumf %36, %37 : vector<2x128xf32>
    %39 = arith.truncf %38 : vector<2x128xf32> to vector<2x128xbf16>
    %c0_29 = arith.constant 0 : index
    %c0_30 = arith.constant 0 : index
    %40 = vector.load %arg11[%c0_29, %c0_30] : memref<128x128xbf16, #tpu.memory_space<vmem>>, vector<128x128xbf16>
    %cst_31 = arith.constant dense<0.000000e+00> : vector<2x128xf32>
    %41 = tpu.matmul %39, %40, %cst_31 {dimension_numbers = #tpu.dot_dimension_numbers<[1], [0], [0], [1], [0, 0, 1, 1], [], []>} : vector<2x128xbf16>, vector<128x128xbf16>, vector<2x128xf32> -> vector<2x128xf32>
    %c0_32 = arith.constant 0 : index
    %c0_33 = arith.constant 0 : index
    %42 = vector.load %arg12[%c0_32, %c0_33] : memref<1x128xf32, #tpu.memory_space<vmem>>, vector<1x128xf32>
    %43 = vector.broadcast %42 : vector<1x128xf32> to vector<2x128xf32>
    %44 = arith.addf %41, %43 : vector<2x128xf32>
    %45 = vector.extract_strided_slice %44 {offsets = [0, 0], sizes = [2, 64], strides = [1, 1]} : vector<2x128xf32> to vector<2x64xf32>
    %46 = vector.extract_strided_slice %44 {offsets = [0, 64], sizes = [2, 64], strides = [1, 1]} : vector<2x128xf32> to vector<2x64xf32>
    %cst_34 = arith.constant 0.000000e+00 : f32
    %47 = vector.broadcast %cst_34 : f32 to vector<2x64xf32>
    %48 = arith.maximumf %46, %47 : vector<2x64xf32>
    %49 = math.absf %46 : vector<2x64xf32>
    %cst_35 = arith.constant 0.000000e+00 : f32
    %50 = vector.broadcast %cst_35 : f32 to vector<2x64xf32>
    %51 = arith.subf %50, %49 : vector<2x64xf32>
    %52 = math.exp %51 : vector<2x64xf32>
    %53 = math.log1p %52 : vector<2x64xf32>
    %54 = arith.addf %48, %53 : vector<2x64xf32>
    %c0_36 = arith.constant 0 : index
    %c0_37 = arith.constant 0 : index
    %55 = vector.load %arg2[%c0_36, %c0_37] : memref<2x64xf32, #tpu.memory_space<vmem>>, vector<2x64xf32>
    %56 = arith.mulf %54, %55 : vector<2x64xf32>
    %57 = arith.addf %45, %56 : vector<2x64xf32>
    %cst_38 = arith.constant -5.000000e-01 : f32
    %58 = vector.broadcast %cst_38 : f32 to vector<2x64xf32>
    %59 = arith.mulf %58, %55 : vector<2x64xf32>
    %60 = arith.mulf %59, %55 : vector<2x64xf32>
    %61 = math.log %54 : vector<2x64xf32>
    %62 = arith.subf %60, %61 : vector<2x64xf32>
    %cst_39 = arith.constant 0.918938517 : f32
    %63 = vector.broadcast %cst_39 : f32 to vector<2x64xf32>
    %64 = arith.subf %62, %63 : vector<2x64xf32>
    %65 = math.tanh %57 : vector<2x64xf32>
    %66 = math.tanh %65 : vector<2x64xf32>
    %67 = arith.mulf %66, %66 : vector<2x64xf32>
    %cst_40 = arith.constant 1.000000e+00 : f32
    %68 = vector.broadcast %cst_40 : f32 to vector<2x64xf32>
    %69 = arith.subf %68, %67 : vector<2x64xf32>
    %cst_41 = arith.constant 1.000000e-07 : f32
    %70 = vector.broadcast %cst_41 : f32 to vector<2x64xf32>
    %71 = arith.addf %69, %70 : vector<2x64xf32>
    %72 = math.log %71 : vector<2x64xf32>
    %73 = arith.subf %64, %72 : vector<2x64xf32>
    %c0_42 = arith.constant 0 : index
    %c0_43 = arith.constant 0 : index
    %74 = vector.load %arg13[%c0_42, %c0_43] : memref<1x64xf32, #tpu.memory_space<vmem>>, vector<1x64xf32>
    %75 = vector.broadcast %74 : vector<1x64xf32> to vector<2x64xf32>
    %76 = arith.mulf %65, %75 : vector<2x64xf32>
    %77 = tpu.concatenate %76, %73 in 1 : vector<2x64xf32>, vector<2x64xf32> -> vector<2x128xf32>
    %c0_44 = arith.constant 0 : index
    %c0_45 = arith.constant 0 : index
    %78 = vector.load %arg14[%c0_44, %c0_45] : memref<2x128xf32, #tpu.memory_space<vmem>>, vector<2x128xf32>
    tpu.vector_store %arg14[%c0_44, %c0_45], %77 {strides = array<i32>} : memref<2x128xf32, #tpu.memory_space<vmem>>, vector<2x128xf32>,
    return
  }
}

</mosaic_0001>

<bundles_post_ra>
// kernel: tpu_custom_call.1
= control target key start
LH: loop header
LB: loop body
LE: loop exit
PB: predicated region body
PF: predicated region fallthrough
CT: control target
= control target key end

     0   :  { %19 = vsyncpa [#allocation3], 0  ;;  %s2801_s0 = inlined_call_operand.hbm [shape: bf16[2,256], index: 0, kind: input, shape index: {}]   ;;  %s2802_s1 = inlined_call_operand.vmem [shape: f32[2,2], index: 1, kind: input, shape index: {}]   ;;  %s2803_s2 = inlined_call_operand.hbm [shape: f32[2,64], index: 2, kind: input, shape index: {}]   ;;  %s2804_s3 = inlined_call_operand.hbm [shape: bf16[256,512], index: 3, kind: input, shape index: {}]   ;;  %s2805_s4 = inlined_call_operand.vmem [shape: f32[1,512], index: 4, kind: input, shape index: {}]   ;;  %s2806_s5 = inlined_call_operand.vmem [shape: f32[2,512], index: 5, kind: input, shape index: {}]   ;;  %s2807_s6 = inlined_call_operand.vmem [shape: f32[1,512], index: 6, kind: input, shape index: {}]   ;;  %s2808_s7 = inlined_call_operand.hbm [shape: bf16[1024,128], index: 7, kind: input, shape index: {}]   ;;  %s2809_s8 = inlined_call_operand.vmem [shape: f32[1,128], index: 8, kind: input, shape index: {}]   ;;  %s2810_s9 = inlined_call_operand.hbm [shape: bf16[128,128], index: 9, kind: input, shape index: {}]   ;;  %s2811_s10 = inlined_call_operand.vmem [shape: f32[1,128], index: 10, kind: input, shape index: {}]   ;;  %s2812_s11 = inlined_call_operand.hbm [shape: bf16[128,128], index: 11, kind: input, shape index: {}]   ;;  %s2813_s12 = inlined_call_operand.vmem [shape: f32[1,128], index: 12, kind: input, shape index: {}]   ;;  %s2814_s13 = inlined_call_operand.vmem [shape: f32[1,64], index: 13, kind: input, shape index: {}]   ;;  %s2815_s14 = inlined_call_operand.hbm [shape: f32[2,128], index: 14, kind: output, shape index: {}]  }
   0x1   :  { %20 = vsyncpa [#allocation6], 0 }
   0x2   :  { %21 = vsyncpa [#allocation9], 0 }
   0x3   :  { %22 = vsyncpa [#allocation12], 0 }
   0x4   :  { %23 = vsyncpa [#allocation4], 0  ;;  %s2515_s29 = smov [#allocation5]   ;;  %s2516_s15 = smov [#allocation8]  }
   0x5   :  { %s42_s30 = sshll.u32 %s2515_s29, 4  ;;  %s69_s16 = sshll.u32 %s2516_s15, 4  ;;  %s43_s30 = int_to_ptr.vmem [resolvable:$true] %s42_s30  ;;  %s2605_s16 = int_to_ptr.vmem [resolvable:$true] %s69_s16 }
   0x6   :  { %s2351_s19 = scalar_lea.hbm %s2803_s2, 32 }
   0x7   :  { %p2352_p0 = scmp.ne.s32.totalorder %s2803_s2, %s2351_s19  ;;  %p2355_p1 = scmp.lt.u32.totalorder %s2351_s19, %s2803_s2 }
   0x9   :  { %p2357_p2 = pnand %p2355_p1, %p2352_p0 }
   0xb   :  { %2360 = shalt.err (!%p2357_p2)
}
   0xc   :  { %s2361_s24 = scalar_lea.vmem %s43_s30, 32  ;;  %p2366_p4 = scmp.lt.s32.totalorder %s43_s30, %s43_s30 }
   0xd   :  { %p2362_p3 = scmp.ne.s32.totalorder %s43_s30, %s2361_s24  ;;  %p2367_p5 = scmp.lt.s32.totalorder %s2361_s24, %s2361_s24 }
   0xf   :  { %p2368_p6 = por %p2367_p5, %p2366_p4 }
  0x11   :  { %p2369_p7 = pnand %p2368_p6, %p2362_p3 }
  0x13   :  { %2372 = shalt.err (!%p2369_p7)
}
  0x14   :  { %45 = dma.hbm_to_vmem [thread:$0]  %s2803_s2, 32, %s43_s30, [#allocation6]  }
  0x15   :  { %s2373_s29 = scalar_lea.hbm %s2808_s7, 8192 }
  0x16   :  { %p2374_p8 = scmp.ne.s32.totalorder %s2808_s7, %s2373_s29  ;;  %p2377_p9 = scmp.lt.u32.totalorder %s2373_s29, %s2808_s7 }
  0x18   :  { %p2379_p10 = pnand %p2377_p9, %p2374_p8 }
  0x1a   :  { %2382 = shalt.err (!%p2379_p10)
}
  0x1b   :  { %s2383_s20 = scalar_lea.vmem %s2605_s16, 8192  ;;  %p2388_p12 = scmp.lt.s32.totalorder %s2605_s16, %s2605_s16 }
  0x1c   :  { %p2384_p11 = scmp.ne.s32.totalorder %s2605_s16, %s2383_s20  ;;  %p2389_p13 = scmp.lt.s32.totalorder %s2383_s20, %s2383_s20 }
  0x1e   :  { %p2390_p0 = por %p2389_p13, %p2388_p12 }
  0x20   :  { %p2391_p1 = pnand %p2390_p0, %p2384_p11 }
  0x22   :  { %2394 = shalt.err (!%p2391_p1)
}
  0x23   :  { %s2517_s2 = smov 64   ;;  %s2518_s30 = smov 4  }
  0x24   :  { %75 = dma.hbm_to_vmem [thread:$0]  %s2808_s7, 8192, %s2605_s16, [#allocation9], %s2517_s2, %s2517_s2, %s2518_s30  }
  0x25   :  { %s2519_s23 = smov [#allocation2]   ;;  %s2520_s25 = smov [#allocation7]  }
  0x26   :  { %s30_s24 = sshll.u32 %s2519_s23, 4  ;;  %s51_s26 = sshll.u32 %s2520_s25, 4  ;;  %s31_s24 = int_to_ptr.vmem [resolvable:$true] %s30_s24  ;;  %s2639_s26 = int_to_ptr.vmem [resolvable:$true] %s51_s26 }
  0x27   :  { %s2395_s29 = scalar_lea.hbm %s2801_s0, 32 }
  0x28   :  { %p2396_p2 = scmp.ne.s32.totalorder %s2801_s0, %s2395_s29  ;;  %p2399_p3 = scmp.lt.u32.totalorder %s2395_s29, %s2801_s0 }
  0x2a   :  { %p2401_p4 = pnand %p2399_p3, %p2396_p2 }
  0x2c   :  { %2404 = shalt.err (!%p2401_p4)
}
  0x2d   :  { %s2405_s7 = scalar_lea.vmem %s31_s24, 32  ;;  %p2410_p6 = scmp.lt.s32.totalorder %s31_s24, %s31_s24 }
  0x2e   :  { %p2406_p5 = scmp.ne.s32.totalorder %s31_s24, %s2405_s7  ;;  %p2411_p7 = scmp.lt.s32.totalorder %s2405_s7, %s2405_s7 }
  0x30   :  { %p2412_p8 = por %p2411_p7, %p2410_p6 }
  0x32   :  { %p2413_p9 = pnand %p2412_p8, %p2406_p5 }
  0x34   :  { %2416 = shalt.err (!%p2413_p9)
}
  0x35   :  { %33 = dma.hbm_to_vmem [thread:$0]  %s2801_s0, 32, %s31_s24, [#allocation3]  }
  0x36   :  { %s2417_s23 = scalar_lea.hbm %s2804_s3, 8192 }
  0x37   :  { %p2418_p10 = scmp.ne.s32.totalorder %s2804_s3, %s2417_s23  ;;  %p2421_p11 = scmp.lt.u32.totalorder %s2417_s23, %s2804_s3 }
  0x39   :  { %p2423_p12 = pnand %p2421_p11, %p2418_p10 }
  0x3b   :  { %2426 = shalt.err (!%p2423_p12)
}
  0x3c   :  { %s2427_s15 = scalar_lea.vmem %s2639_s26, 8192  ;;  %p2432_p0 = scmp.lt.s32.totalorder %s2639_s26, %s2639_s26 }
  0x3d   :  { %p2428_p13 = scmp.ne.s32.totalorder %s2639_s26, %s2427_s15  ;;  %p2433_p1 = scmp.lt.s32.totalorder %s2427_s15, %s2427_s15 }
  0x3f   :  { %p2434_p2 = por %p2433_p1, %p2432_p0 }
  0x41   :  { %p2435_p3 = pnand %p2434_p2, %p2428_p13 }
  0x43   :  { %2438 = shalt.err (!%p2435_p3)
}
  0x44   :  { %s2521_s0 = smov 256   ;;  %s2522_s24 = smov 16  }
  0x45   :  { %57 = dma.hbm_to_vmem [thread:$0]  %s2804_s3, 8192, %s2639_s26, [#allocation6], %s2521_s0, %s2521_s0, %s2522_s24  }
  0x46   :  { %s2523_s19 = smov [#allocation10]   ;;  %s2524_s16 = smov [#allocation11]  }
  0x47   :  { %s83_s7 = sshll.u32 %s2523_s19, 4  ;;  %s97_s20 = sshll.u32 %s2524_s16, 4  ;;  %s84_s7 = int_to_ptr.vmem [resolvable:$true] %s83_s7  ;;  %s2670_s20 = int_to_ptr.vmem [resolvable:$true] %s97_s20 }
  0x48   :  { %s2439_s23 = scalar_lea.hbm %s2810_s9, 1024 }
  0x49   :  { %p2440_p4 = scmp.ne.s32.totalorder %s2810_s9, %s2439_s23  ;;  %p2443_p5 = scmp.lt.u32.totalorder %s2439_s23, %s2810_s9 }
  0x4b   :  { %p2445_p6 = pnand %p2443_p5, %p2440_p4 }
  0x4d   :  { %2448 = shalt.err (!%p2445_p6)
}
  0x4e   :  { %s2449_s3 = scalar_lea.vmem %s84_s7, 1024  ;;  %p2454_p8 = scmp.lt.s32.totalorder %s84_s7, %s84_s7 }
  0x4f   :  { %p2450_p7 = scmp.ne.s32.totalorder %s84_s7, %s2449_s3  ;;  %p2455_p9 = scmp.lt.s32.totalorder %s2449_s3, %s2449_s3 }
  0x51   :  { %p2456_p10 = por %p2455_p9, %p2454_p8 }
  0x53   :  { %p2457_p11 = pnand %p2456_p10, %p2450_p7 }
  0x55   :  { %2460 = shalt.err (!%p2457_p11)
}
  0x56   :  { %89 = dma.hbm_to_vmem [thread:$0]  %s2810_s9, 1024, %s84_s7, [#allocation9], %s2517_s2, %s2517_s2, %s2518_s30  }
  0x57   :  { %s2461_s17 = scalar_lea.hbm %s2812_s11, 1024 }
  0x58   :  { %p2462_p12 = scmp.ne.s32.totalorder %s2812_s11, %s2461_s17  ;;  %p2465_p13 = scmp.lt.u32.totalorder %s2461_s17, %s2812_s11 }
  0x5a   :  { %p2467_p0 = pnand %p2465_p13, %p2462_p12 }
  0x5c   :  { %2470 = shalt.err (!%p2467_p0)
}
  0x5d   :  { %s2471_s22 = scalar_lea.vmem %s2670_s20, 1024  ;;  %p2476_p2 = scmp.lt.s32.totalorder %s2670_s20, %s2670_s20 }
  0x5e   :  { %p2472_p1 = scmp.ne.s32.totalorder %s2670_s20, %s2471_s22  ;;  %p2477_p3 = scmp.lt.s32.totalorder %s2471_s22, %s2471_s22 }
  0x60   :  { %p2478_p4 = por %p2477_p3, %p2476_p2 }
  0x62   :  { %p2479_p5 = pnand %p2478_p4, %p2472_p1 }
  0x64   :  { %2482 = shalt.err (!%p2479_p5)
}
  0x65   :  { %103 = dma.hbm_to_vmem [thread:$0]  %s2812_s11, 1024, %s2670_s20, [#allocation12], %s2517_s2, %s2517_s2, %s2518_s30  }
  0x66   :  { %2505 = dma.done.wait [#allocation3], 32  }
  0x67   :  { %2506 = vsyncadd [#allocation3], 4294967264 }
  0x68   :  { %2507 = dma.done.wait [#allocation6], 8224  }
  0x69   :  { %2508 = vsyncadd [#allocation6], 4294959072 }
  0x6a   :  { %2509 = dma.done.wait [#allocation9], 9216  }
  0x6b   :  { %2510 = vsyncadd [#allocation9], 4294958080 }
  0x6c   :  { %2511 = dma.done.wait [#allocation12], 1024  }
  0x6d   :  { %2512 = vsyncadd [#allocation12], 4294966272  ;;  %v2162_v0 = vld [vmem:[#allocation7 + $0x4] ss:$16 sps:$4 sm:$0xff]   ;;  %v2164_v1 = vld [vmem:[#allocation7 + $0xc] ss:$16 sps:$4 sm:$0xff]   ;;  %v194_v38 = vlaneseq }
  0x6e   :  { %559 = vmatprep.subr.bf16.mxu0 %v2162_v0  ;;  %v2166_v2 = vld [vmem:[#allocation7] ss:$16 sps:$4 sm:$0xff]   ;;  %v2167_v3 = vld [vmem:[#allocation7 + $0x8] ss:$16 sps:$4 sm:$0xff]   ;;  %600 = vmatprep.subr.bf16.mxu1 %v2164_v1  ;;  %v2168_v4 = vld [vmem:[#allocation7 + $0x24] ss:$16 sps:$4 sm:$0xff]  }
  0x6f   :  { %560 = vmatpush1.bf16.msra.mxu0 %v2166_v2  ;;  %601 = vmatpush1.bf16.msra.mxu1 %v2167_v3  ;;  %v2170_v5 = vld [vmem:[#allocation7 + $0x2c] ss:$16 sps:$4 sm:$0xff]   ;;  %v2172_v6 = vld [vmem:[#allocation7 + $0x20] ss:$16 sps:$4 sm:$0xff]   ;;  %v2173_v7 = vld [vmem:[#allocation7 + $0x28] ss:$16 sps:$4 sm:$0xff]  }
  0x70   :  { %561 = vmatprep.subr.bf16.mxu0 %v2168_v4  ;;  %602 = vmatprep.subr.bf16.mxu1 %v2170_v5  ;;  %v2174_v8 = vld [vmem:[#allocation7 + $0x44] ss:$16 sps:$4 sm:$0xff]   ;;  %v2176_v9 = vld [vmem:[#allocation7 + $0x4c] ss:$16 sps:$4 sm:$0xff]   ;;  %v2178_v10 = vld [vmem:[#allocation7 + $0x40] ss:$16 sps:$4 sm:$0xff]  }
  0x71   :  { %v2179_v11 = vld [vmem:[#allocation7 + $0x48] ss:$16 sps:$4 sm:$0xff]   ;;  %v2180_v12 = vld [vmem:[#allocation7 + $0x64] ss:$16 sps:$4 sm:$0xff]   ;;  %v2182_v13 = vld [vmem:[#allocation7 + $0x6c] ss:$16 sps:$4 sm:$0xff]  }
  0x72   :  { %v2184_v14 = vld [vmem:[#allocation7 + $0x60] ss:$16 sps:$4 sm:$0xff]   ;;  %v2185_v15 = vld [vmem:[#allocation7 + $0x68] ss:$16 sps:$4 sm:$0xff]   ;;  %v2186_v16 = vld [vmem:[#allocation7 + $0x84] ss:$16 sps:$4 sm:$0xff]  }
  0x73   :  { %562 = vmatpush1.bf16.msra.mxu0 %v2172_v6  ;;  %603 = vmatpush1.bf16.msra.mxu1 %v2173_v7  ;;  %v2188_v17 = vld [vmem:[#allocation7 + $0x8c] ss:$16 sps:$4 sm:$0xff]   ;;  %v2190_v18 = vld [vmem:[#allocation7 + $0x80] ss:$16 sps:$4 sm:$0xff]   ;;  %v2191_v19 = vld [vmem:[#allocation7 + $0x88] ss:$16 sps:$4 sm:$0xff]  }
  0x74   :  { %563 = vmatprep.subr.bf16.mxu0 %v2174_v8  ;;  %604 = vmatprep.subr.bf16.mxu1 %v2176_v9  ;;  %v2192_v20 = vld [vmem:[#allocation7 + $0xa4] ss:$16 sps:$4 sm:$0xff]   ;;  %v2194_v21 = vld [vmem:[#allocation7 + $0xac] ss:$16 sps:$4 sm:$0xff]   ;;  %v2196_v22 = vld [vmem:[#allocation7 + $0xa0] ss:$16 sps:$4 sm:$0xff]  }
  0x75   :  { %v2197_v23 = vld [vmem:[#allocation7 + $0xa8] ss:$16 sps:$4 sm:$0xff]   ;;  %v2198_v24 = vld [vmem:[#allocation7 + $0xc4] ss:$16 sps:$4 sm:$0xff]   ;;  %v2200_v25 = vld [vmem:[#allocation7 + $0xcc] ss:$16 sps:$4 sm:$0xff]  }
  0x76   :  { %v2202_v26 = vld [vmem:[#allocation7 + $0xc0] ss:$16 sps:$4 sm:$0xff]   ;;  %v2203_v27 = vld [vmem:[#allocation7 + $0xc8] ss:$16 sps:$4 sm:$0xff]   ;;  %v2204_v28 = vld [vmem:[#allocation7 + $0xe4] ss:$16 sps:$4 sm:$0xff]  }
  0x77   :  { %564 = vmatpush1.bf16.msra.mxu0 %v2178_v10  ;;  %605 = vmatpush1.bf16.msra.mxu1 %v2179_v11  ;;  %v2206_v29 = vld [vmem:[#allocation7 + $0xec] ss:$16 sps:$4 sm:$0xff]   ;;  %v2208_v30 = vld [vmem:[#allocation7 + $0xe0] ss:$16 sps:$4 sm:$0xff]   ;;  %v2209_v31 = vld [vmem:[#allocation7 + $0xe8] ss:$16 sps:$4 sm:$0xff]  }
  0x78   :  { %565 = vmatprep.subr.bf16.mxu0 %v2180_v12  ;;  %606 = vmatprep.subr.bf16.mxu1 %v2182_v13  ;;  %v2210_v32 = vld [vmem:[#allocation7 + $0x104] ss:$16 sps:$4 sm:$0xff]   ;;  %v2212_v33 = vld [vmem:[#allocation7 + $0x10c] ss:$16 sps:$4 sm:$0xff]   ;;  %v2214_v34 = vld [vmem:[#allocation7 + $0x100] ss:$16 sps:$4 sm:$0xff]  }
  0x79   :  { %v2215_v35 = vld [vmem:[#allocation7 + $0x108] ss:$16 sps:$4 sm:$0xff]   ;;  %v2216_v36 = vld [vmem:[#allocation7 + $0x124] ss:$16 sps:$4 sm:$0xff]   ;;  %v2218_v37 = vld [vmem:[#allocation7 + $0x12c] ss:$16 sps:$4 sm:$0xff]  }
  0x7a   :  { %v2525_v39 = vmov 1966171168   ;;  %v2220_v41 = vld [vmem:[#allocation7 + $0x120] ss:$16 sps:$4 sm:$0xff]   ;;  %v2221_v42 = vld [vmem:[#allocation7 + $0x128] ss:$16 sps:$4 sm:$0xff]  }
  0x7b   :  { %566 = vmatpush1.bf16.msra.mxu0 %v2184_v14  ;;  %607 = vmatpush1.bf16.msra.mxu1 %v2185_v15  ;;  %v224_v40 = vunpack.c.l.s4 %v2525_v39  ;;  %v2222_v43 = vld [vmem:[#allocation7 + $0x144] ss:$16 sps:$4 sm:$0xff]   ;;  %v2224_v44 = vld [vmem:[#allocation7 + $0x14c] ss:$16 sps:$4 sm:$0xff]   ;;  %v2707_v45 = vshrl.u32 %v194_v38, 7  ;;  %vm691_vm0 = vcmask 1041408  }
  0x7c   :  { %567 = vmatprep.subr.bf16.mxu0 %v2186_v16  ;;  %608 = vmatprep.subr.bf16.mxu1 %v2188_v17  ;;  %v2226_v47 = vld [vmem:[#allocation7 + $0x140] ss:$16 sps:$4 sm:$0xff]   ;;  %v2227_v48 = vld [vmem:[#allocation7 + $0x148] ss:$16 sps:$4 sm:$0xff]   ;;  %v2228_v49 = vld [vmem:[#allocation7 + $0x164] ss:$16 sps:$4 sm:$0xff]  }
  0x7d   :  { %v225_v46 = vunpack.c.0.s8 %v224_v40  ;;  %v2230_v50 = vld [vmem:[#allocation7 + $0x16c] ss:$16 sps:$4 sm:$0xff]   ;;  %v2232_v51 = vld [vmem:[#allocation7 + $0x160] ss:$16 sps:$4 sm:$0xff]   ;;  %v2233_v53 = vld [vmem:[#allocation7 + $0x168] ss:$16 sps:$4 sm:$0xff]  }
  0x7e   :  { %v1845_v54 = vld.sshfl [vmem:[#allocation2] sm:$0x11 pattern:$0x75316420]  ;;  %v2234_v55 = vld [vmem:[#allocation7 + $0x184] ss:$16 sps:$4 sm:$0xff]  }
  0x7f   :  { %568 = vmatpush1.bf16.msra.mxu0 %v2190_v18  ;;  %609 = vmatpush1.bf16.msra.mxu1 %v2191_v19  ;;  %v228_v52 = vsub.s32 %v225_v46, %v2707_v45  ;;  %v222_v56 = vcombine.high %v1845_v54, %v1845_v54  ;;  %v2236_v57 = vld [vmem:[#allocation7 + $0x18c] ss:$16 sps:$4 sm:$0xff]   ;;  %v2526_v58 = vmov 1983009808   ;;  %v2238_v60 = vld [vmem:[#allocation7 + $0x180] ss:$16 sps:$4 sm:$0xff]  }
  0x80   :  { %569 = vmatprep.subr.bf16.mxu0 %v2192_v20  ;;  %610 = vmatprep.subr.bf16.mxu1 %v2194_v21  ;;  %v672_v59 = vunpack.c.l.s4 %v2526_v58  ;;  %v2239_v62 = vld [vmem:[#allocation7 + $0x188] ss:$16 sps:$4 sm:$0xff]   ;;  %v2240_v63 = vld [vmem:[#allocation7 + $0x1a4] ss:$16 sps:$4 sm:$0xff]   ;;  %v2242_v0 = vld [vmem:[#allocation7 + $0x1ac] ss:$16 sps:$4 sm:$0xff]  }
  0x81   :  { %v236_v61 = vrot.slane %v222_v56, %v228_v52  ;;  %v2244_v2 = vld [vmem:[#allocation7 + $0x1a0] ss:$16 sps:$4 sm:$0xff]   ;;  %v646_v3 = vld [vmem:[%s2806_s5] sm:$0xff]  ;;  %v2248_v6 = vld [vmem:[#allocation7 + $0x1cc] ss:$16 sps:$4 sm:$0xff]   ;;  %v229_v19 = vrot.slane %v1845_v54, %v228_v52  ;;  %vm687_vm1 = vcmask 15360  }
  0x82   :  { %v673_v1 = vunpack.c.0.s8 %v672_v59  ;;  %v2245_v4 = vld [vmem:[#allocation7 + $0x1a8] ss:$16 sps:$4 sm:$0xff]   ;;  %v2246_v5 = vld [vmem:[#allocation7 + $0x1c4] ss:$16 sps:$4 sm:$0xff]   ;;  %v670_v8 = vcombine.high %v646_v3, %v646_v3  ;;  %v2250_v9 = vld [vmem:[#allocation7 + $0x1c0] ss:$16 sps:$4 sm:$0xff]  }
  0x83   :  { %570 = vmatpush1.bf16.msra.mxu0 %v2196_v22  ;;  %611 = vmatpush1.bf16.msra.mxu1 %v2197_v23  ;;  %v2251_v10 = vld [vmem:[#allocation7 + $0x1c8] ss:$16 sps:$4 sm:$0xff]   ;;  %v2252_v11 = vld [vmem:[#allocation7 + $0x1e4] ss:$16 sps:$4 sm:$0xff]   ;;  %v2254_v12 = vld [vmem:[#allocation7 + $0x1ec] ss:$16 sps:$4 sm:$0xff]  }
  0x84   :  { %571 = vmatprep.subr.bf16.mxu0 %v2198_v24  ;;  %612 = vmatprep.subr.bf16.mxu1 %v2200_v25  ;;  %v676_v7 = vsub.s32 %v673_v1, %v2707_v45  ;;  %v2256_v15 = vld [vmem:[#allocation7 + $0x1e0] ss:$16 sps:$4 sm:$0xff]   ;;  %v2257_v16 = vld [vmem:[#allocation7 + $0x1e8] ss:$16 sps:$4 sm:$0xff]   ;;  %v2527_v22 = vmov 0.0   ;;  %vm2528_vm6 = vmmov 0  }
  0x85   :  { %591 = vmatprep.mubr.bf16.mxu0 %v236_v61  ;;  %632 = vmatprep.mubr.bf16.mxu1 %v236_v61  ;;  %v2259_v20 = vld [vmem:[#allocation8 + $0x140] sm:$0xff]   ;;  %v2282_v46 = vld [vmem:[#allocation8 + $0x1a8] sm:$0xff]   ;;  %v2288_v52 = vld [vmem:[#allocation8 + $0x1f8] sm:$0xff]   ;;  %v200_v61 = vsub.s32 1, %v2707_v45  ;;  %s2529_s26 = smov [#allocation13]   ;;  %vm1824_vm8 = vcmask 523264  }
  0x86   :  { %v677_v13 = vrot.slane %v646_v3, %v676_v7  ;;  %v684_v14 = vrot.slane %v670_v8, %v676_v7  ;;  %v2260_v21 = vld [vmem:[#allocation8 + $0x1c0] sm:$0xff]   ;;  %v2290_v54 = vld [vmem:[#allocation8 + $0x1b8] sm:$0xff]   ;;  %v196_v3 = vsub.s32 0, %v2707_v45  ;;  %s1833_s15 = sshll.u32 %s2529_s26, 4  ;;  %s1834_s15 = int_to_ptr.vmem [resolvable:$true] %s1833_s15 }
  0x87   :  { %572 = vmatpush1.bf16.msra.mxu0 %v2202_v26  ;;  %613 = vmatpush1.bf16.msra.mxu1 %v2203_v27  ;;  %v645_v23 = vld [vmem:[%s2802_s1] sm:$0x3]  ;;  %v2263_v26 = vld [vmem:[#allocation8 + $0x148] sm:$0xff]   ;;  %s2483_s0 = scalar_lea.vmem %s1834_s15, 32  ;;  %p2488_p7 = scmp.lt.s32.totalorder %s1834_s15, %s1834_s15 }
  0x88   :  { %573 = vmatprep.subr.bf16.mxu0 %v2204_v28  ;;  %614 = vmatprep.subr.bf16.mxu1 %v2206_v29  ;;  %v685_v17 = vcombine.high %v677_v13, %v677_v13  ;;  %v686_v18 = vcombine.high %v684_v14, %v684_v14  ;;  %v2261_v24 = vld [vmem:[#allocation8 + $0x100] sm:$0xff]   ;;  %v2264_v27 = vld [vmem:[#allocation8 + $0x1c8] sm:$0xff]   ;;  %p2484_p6 = scmp.ne.s32.totalorder %s1834_s15, %s2483_s0  ;;  %p2489_p8 = scmp.lt.s32.totalorder %s2483_s0, %s2483_s0 }
  0x89   :  { %v2262_v25 = vld [vmem:[#allocation8 + $0x180] sm:$0xff]   ;;  %v2265_v28 = vld [vmem:[#allocation8 + $0x108] sm:$0xff]  }
  0x8a   :  { %v2266_v29 = vld [vmem:[#allocation8 + $0x188] sm:$0xff]   ;;  %v2275_v38 = vld [vmem:[#allocation8 + $0x160] sm:$0xff]   ;;  %p2490_p9 = por %p2489_p8, %p2488_p7 }
  0x8b   :  { %574 = vmatpush1.bf16.msra.mxu0 %v2208_v30  ;;  %615 = vmatpush1.bf16.msra.mxu1 %v2209_v31  ;;  %v2267_v30 = vld [vmem:[#allocation8 + $0x150] sm:$0xff]   ;;  %v2276_v39 = vld [vmem:[#allocation8 + $0x1e0] sm:$0xff]  }
  0x8c   :  { %575 = vmatprep.subr.bf16.mxu0 %v2210_v32  ;;  %616 = vmatprep.subr.bf16.mxu1 %v2212_v33  ;;  %v2268_v31 = vld [vmem:[#allocation8 + $0x1d0] sm:$0xff]   ;;  %v2277_v40 = vld [vmem:[#allocation8 + $0x120] sm:$0xff]   ;;  %p2491_p10 = pnand %p2490_p9, %p2484_p6 }
  0x8d   :  { %v2269_v32 = vld [vmem:[#allocation8 + $0x110] sm:$0xff]   ;;  %v2292_v56 = vld [vmem:[#allocation8 + $0xc0] sm:$0xff]  }
  0x8e   :  { %v2270_v33 = vld [vmem:[#allocation8 + $0x190] sm:$0xff]   ;;  %v647_v1 = vld [vmem:[%s2807_s6] sm:$0xf] }
  0x8f   :  { %576 = vmatpush1.bf16.msra.mxu0 %v2214_v34  ;;  %617 = vmatpush1.bf16.msra.mxu1 %v2215_v35  ;;  %v2271_v34 = vld [vmem:[#allocation8 + $0x158] sm:$0xff]   ;;  %v652_v7 = vrot.slane %v647_v1, %v196_v3 }
  0x90   :  { %577 = vmatprep.subr.bf16.mxu0 %v2216_v36  ;;  %618 = vmatprep.subr.bf16.mxu1 %v2218_v37  ;;  %v2272_v35 = vld [vmem:[#allocation8 + $0x1d8] sm:$0xff]  }
  0x91   :  { %v2273_v36 = vld [vmem:[#allocation8 + $0x118] sm:$0xff]  }
  0x92   :  { %v2274_v37 = vld [vmem:[#allocation8 + $0x198] sm:$0xff]  }
  0x93   :  { %578 = vmatpush1.bf16.msra.mxu0 %v2220_v41  ;;  %619 = vmatpush1.bf16.msra.mxu1 %v2221_v42  ;;  %v2278_v41 = vld [vmem:[#allocation8 + $0x1a0] sm:$0xff]   ;;  %v2279_v42 = vld [vmem:[#allocation8 + $0x168] sm:$0xff]  }
  0x94   :  { %579 = vmatprep.subr.bf16.mxu0 %v2222_v43  ;;  %620 = vmatprep.subr.bf16.mxu1 %v2224_v44  ;;  %v2280_v43 = vld [vmem:[#allocation8 + $0x1e8] sm:$0xff]  }
  0x95   :  { %v2281_v44 = vld [vmem:[#allocation8 + $0x128] sm:$0xff]  }
  0x97   :  { %580 = vmatpush1.bf16.msra.mxu0 %v2226_v47  ;;  %621 = vmatpush1.bf16.msra.mxu1 %v2227_v48  ;;  %v2283_v47 = vld [vmem:[#allocation8 + $0x170] sm:$0xff]  }
  0x98   :  { %581 = vmatprep.subr.bf16.mxu0 %v2228_v49  ;;  %622 = vmatprep.subr.bf16.mxu1 %v2230_v50  ;;  %v2284_v48 = vld [vmem:[#allocation8 + $0x1f0] sm:$0xff]  }
  0x99   :  { %v2285_v49 = vld [vmem:[#allocation8 + $0x130] sm:$0xff]  }
  0x9a   :  { %v2286_v50 = vld [vmem:[#allocation8 + $0x1b0] sm:$0xff]  }
  0x9b   :  { %582 = vmatpush1.bf16.msra.mxu0 %v2232_v51  ;;  %623 = vmatpush1.bf16.msra.mxu1 %v2233_v53  ;;  %v2287_v51 = vld [vmem:[#allocation8 + $0x178] sm:$0xff]  }
  0x9c   :  { %583 = vmatprep.subr.bf16.mxu0 %v2234_v55  ;;  %624 = vmatprep.subr.bf16.mxu1 %v2236_v57  ;;  %v2289_v53 = vld [vmem:[#allocation8 + $0x138] sm:$0xff]   ;;  %v2291_v55 = vld [vmem:[#allocation8 + $0x40] sm:$0xff]  }
  0x9f   :  { %584 = vmatpush1.bf16.msra.mxu0 %v2238_v60  ;;  %625 = vmatpush1.bf16.msra.mxu1 %v2239_v62  ;;  %v208_v62 = vsub.s32 3, %v2707_v45 }
  0xa0   :  { %585 = vmatprep.subr.bf16.mxu0 %v2240_v63  ;;  %626 = vmatprep.subr.bf16.mxu1 %v2242_v0 }
  0xa3   :  { %586 = vmatpush1.bf16.msra.mxu0 %v2244_v2  ;;  %627 = vmatpush1.bf16.msra.mxu1 %v2245_v4  ;;  %v2737_v2 = vld [vmem:[%s2805_s4] sm:$0xf]  ;;  %v204_v4 = vsub.s32 2, %v2707_v45  ;;  %v2321_v45 = vld [vmem:[#allocation8 + $0x38] sm:$0xff]  }
  0xa4   :  { %587 = vmatprep.subr.bf16.mxu0 %v2246_v5  ;;  %628 = vmatprep.subr.bf16.mxu1 %v2248_v6 }
  0xa5   :  { %v660_v8 = vrot.slane %v647_v1, %v204_v4 }
  0xa7   :  { %588 = vmatpush1.bf16.msra.mxu0 %v2250_v9  ;;  %629 = vmatpush1.bf16.msra.mxu1 %v2251_v10  ;;  %v201_v9 = vrot.slane %v2737_v2, %v200_v61  ;;  %v209_v10 = vrot.slane %v2737_v2, %v208_v62 }
  0xa8   :  { %589 = vmatprep.subr.bf16.mxu0 %v2252_v11  ;;  %630 = vmatprep.subr.bf16.mxu1 %v2254_v12  ;;  %v656_v11 = vrot.slane %v647_v1, %v200_v61  ;;  %v664_v12 = vrot.slane %v647_v1, %v208_v62  ;;  %v2311_v61 = vld [vmem:[#allocation8 + $0x68] sm:$0xff]   ;;  %v197_v1 = vrot.slane %v2737_v2, %v196_v3  ;;  %v2320_v3 = vld [vmem:[#allocation8 + $0xf8] sm:$0xff]  }
  0xa9   :  { %v2312_v62 = vld [vmem:[#allocation8 + $0xe8] sm:$0xff]  }
  0xab   :  { %590 = vmatpush1.bf16.msra.mxu0 %v2256_v15  ;;  %631 = vmatpush1.bf16.msra.mxu1 %v2257_v16 }
  0xac   :  { %1910 = vmatprep.subr.msk.mxu0 %vm691_vm0, %v685_v17  ;;  %1913 = vmatprep.subr.msk.mxu1 %vm691_vm0, %v686_v18 }
  0xae   :  { %592 = vmatmul.mubr.bf16.vlgmr.msra.gmra.mrb[0].mxu0 %v229_v19  ;;  %633 = vmatmul.mubr.bf16.vlgmr.msra.gmra.mrb[0].mxu1 %v229_v19 }
  0xaf   :  { %1911 = vmatpush1.msk.msra.mxu0 %vm691_vm0, %v677_v13  ;;  %1914 = vmatpush1.msk.msra.mxu1 %vm691_vm0, %v684_v14 }
  0xb0   :  { %764 = vmatprep.mubr.f32.mxu0 %v2527_v22  ;;  %835 = vmatprep.mubr.f32.mxu1 %v2527_v22 }
  0xb1   :  { %2001 = vmatprep.subr.bf16.mxu0 %v2259_v20  ;;  %2023 = vmatprep.subr.bf16.mxu1 %v2260_v21 }
  0xb6   :  { %1912 = vmatmul.mubr.msk.f32.vlgmr.msra.gmra.mrb[4].mxu0 %vm687_vm1, %v645_v23  ;;  %1915 = vmatmul.mubr.msk.f32.vlgmr.msra.gmra.mrb[4].mxu1 %vm687_vm1, %v645_v23 }
  0xb7   :  { %2002 = vmatpush3.bf16.msra.mxu0 %v2261_v24  ;;  %2024 = vmatpush3.bf16.msra.mxu1 %v2262_v25 }
  0xb8   :  { %2003 = vmatprep.subr.bf16.mxu0 %v2263_v26  ;;  %2025 = vmatprep.subr.bf16.mxu1 %v2264_v27 }
  0xbb   :  { %2004 = vmatpush3.bf16.msra.mxu0 %v2265_v28  ;;  %2026 = vmatpush3.bf16.msra.mxu1 %v2266_v29 }
  0xbc   :  { %2005 = vmatprep.subr.bf16.mxu0 %v2267_v30  ;;  %2027 = vmatprep.subr.bf16.mxu1 %v2268_v31 }
  0xbf   :  { %2006 = vmatpush3.bf16.msra.mxu0 %v2269_v32  ;;  %2028 = vmatpush3.bf16.msra.mxu1 %v2270_v33 }
  0xc0   :  { %2007 = vmatprep.subr.bf16.mxu0 %v2271_v34  ;;  %2029 = vmatprep.subr.bf16.mxu1 %v2272_v35 }
  0xc3   :  { %2008 = vmatpush3.bf16.msra.mxu0 %v2273_v36  ;;  %2030 = vmatpush3.bf16.msra.mxu1 %v2274_v37  ;;  %v2293_v36 = vld [vmem:[#allocation8] sm:$0xff]  }
  0xc4   :  { %2009 = vmatprep.subr.bf16.mxu0 %v2275_v38  ;;  %2031 = vmatprep.subr.bf16.mxu1 %v2276_v39  ;;  %v2294_v37 = vld [vmem:[#allocation8 + $0x80] sm:$0xff]  }
  0xc7   :  { %2010 = vmatpush3.bf16.msra.mxu0 %v2277_v40  ;;  %2032 = vmatpush3.bf16.msra.mxu1 %v2278_v41  ;;  %v2295_v40 = vld [vmem:[#allocation8 + $0x48] sm:$0xff]  }
  0xc8   :  { %2011 = vmatprep.subr.bf16.mxu0 %v2279_v42  ;;  %2033 = vmatprep.subr.bf16.mxu1 %v2280_v43  ;;  %v2296_v41 = vld [vmem:[#allocation8 + $0xc8] sm:$0xff]  }
  0xcb   :  { %2012 = vmatpush3.bf16.msra.mxu0 %v2281_v44  ;;  %2034 = vmatpush3.bf16.msra.mxu1 %v2282_v46  ;;  %v2297_v44 = vld [vmem:[#allocation8 + $0x8] sm:$0xff]  }
  0xcc   :  { %2013 = vmatprep.subr.bf16.mxu0 %v2283_v47  ;;  %2035 = vmatprep.subr.bf16.mxu1 %v2284_v48  ;;  %v2298_v46 = vld [vmem:[#allocation8 + $0x88] sm:$0xff]   ;;  %v2299_v47 = vld [vmem:[#allocation8 + $0x50] sm:$0xff]  }
  0xcd   :  { %v2300_v48 = vld [vmem:[#allocation8 + $0xd0] sm:$0xff]  }
  0xcf   :  { %2014 = vmatpush3.bf16.msra.mxu0 %v2285_v49  ;;  %2036 = vmatpush3.bf16.msra.mxu1 %v2286_v50  ;;  %v2301_v49 = vld [vmem:[#allocation8 + $0x10] sm:$0xff]  }
  0xd0   :  { %2015 = vmatprep.subr.bf16.mxu0 %v2287_v51  ;;  %2037 = vmatprep.subr.bf16.mxu1 %v2288_v52  ;;  %v2302_v50 = vld [vmem:[#allocation8 + $0x90] sm:$0xff]   ;;  %v2303_v51 = vld [vmem:[#allocation8 + $0x58] sm:$0xff]  }
  0xd1   :  { %v2304_v52 = vld [vmem:[#allocation8 + $0xd8] sm:$0xff]  }
  0xd3   :  { %2016 = vmatpush3.bf16.msra.mxu0 %v2289_v53  ;;  %2038 = vmatpush3.bf16.msra.mxu1 %v2290_v54  ;;  %v2305_v53 = vld [vmem:[#allocation8 + $0x18] sm:$0xff]  }
  0xd4   :  { %2045 = vmatprep.subr.bf16.mxu0 %v2291_v55  ;;  %2067 = vmatprep.subr.bf16.mxu1 %v2292_v56  ;;  %v2306_v54 = vld [vmem:[#allocation8 + $0x98] sm:$0xff]   ;;  %v2307_v55 = vld [vmem:[#allocation8 + $0x60] sm:$0xff]  }
  0xd5   :  { %v2308_v56 = vld [vmem:[#allocation8 + $0xe0] sm:$0xff]  }
 0x181   :  { %v2725_v57 = vpop.f32.mrb[0].mxu0  ;;  %v2727_v58 = vpop.f32.mrb[0].mxu1 }
 0x182   :  { %v595_v59 = vpop.f32.mrb[1].mxu0  ;;  %v636_v60 = vpop.f32.mrb[1].mxu1 }
 0x183   :  { %v597_v63 = vpop.f32.mrb[2].mxu0  ;;  %v638_v0 = vpop.f32.mrb[2].mxu1  ;;  %v596_v19 = vadd.f32 %v595_v59, %v201_v9  ;;  %v637_v20 = vadd.f32 %v636_v60, %v209_v10  ;;  %v2309_v59 = vld [vmem:[#allocation8 + $0x20] sm:$0xff]   ;;  %v2318_v9 = vld [vmem:[#allocation8 + $0xb0] sm:$0xff]   ;;  %v594_v10 = vadd.f32 %v2725_v57, %v197_v1 }
 0x184   :  { %v598_v5 = vpop.f32.mrb[3].mxu0  ;;  %v639_v6 = vpop.f32.mrb[3].mxu1  ;;  %v2310_v60 = vld [vmem:[#allocation8 + $0xa0] sm:$0xff]   ;;  %v2313_v63 = vld [vmem:[#allocation8 + $0x28] sm:$0xff]  }
 0x185   :  { %v642_v30 = vmax.f32 %v596_v19, 0.0  ;;  %v644_v31 = vmax.f32 %v637_v20, 0.0  ;;  %v2314_v0 = vld [vmem:[#allocation8 + $0xa8] sm:$0xff]   ;;  %v205_v5 = vrot.slane %v2737_v2, %v204_v4  ;;  %v2315_v6 = vld [vmem:[#allocation8 + $0x70] sm:$0xff]   ;;  %v2322_v2 = vld [vmem:[#allocation8 + $0xb8] sm:$0xff]   ;;  %v641_v4 = vmax.f32 %v594_v10, 0.0 }
 0x186   :  { %v2323_v57 = vld [vmem:[#allocation10] sm:$0xff]   ;;  %v2328_v19 = vld [vmem:[#allocation10 + $0x28] sm:$0xff]   ;;  %v2329_v20 = vld [vmem:[#allocation10 + $0x30] sm:$0xff]  }
 0x187   :  { %v855_v42 = vpack.c.bf16 %v642_v30, %v642_v30  ;;  %v857_v43 = vpack.c.bf16 %v644_v31, %v644_v31 }
 0x189   :  { %v766_v13 = vpop.f32.mrb[4].mxu0  ;;  %v837_v14 = vpop.f32.mrb[4].mxu1 }
 0x18a   :  { %v767_v15 = vadd.f32 %v766_v13, %v652_v7  ;;  %v838_v16 = vadd.f32 %v837_v14, %v660_v8  ;;  %v768_v17 = vpop.f32.mrb[5].mxu0  ;;  %v839_v18 = vpop.f32.mrb[5].mxu1  ;;  %v2316_v7 = vld [vmem:[#allocation8 + $0xf0] sm:$0xff]   ;;  %v854_v14 = vpack.c.bf16 %v641_v4, %v641_v4 }
 0x18b   :  { %v769_v21 = vadd.f32 %v768_v17, %v656_v11  ;;  %v840_v23 = vadd.f32 %v839_v18, %v664_v12  ;;  %v2317_v8 = vld [vmem:[#allocation8 + $0x30] sm:$0xff]   ;;  %v635_v11 = vadd.f32 %v2727_v58, %v205_v5  ;;  %v2319_v12 = vld [vmem:[#allocation8 + $0x78] sm:$0xff]   ;;  %v2324_v58 = vld [vmem:[#allocation10 + $0x8] sm:$0xff]  }
 0x18c   :  { %vm842_vm2 = vcmp.ge.f32.partialorder %v767_v15, 0.0  ;;  %v846_v24 = vmul.f32 0.01, %v767_v15  ;;  %vm844_vm3 = vcmp.ge.f32.partialorder %v838_v16, 0.0  ;;  %v848_v25 = vmul.f32 0.01, %v838_v16 }
 0x18d   :  { %vm843_vm4 = vcmp.ge.f32.partialorder %v769_v21, 0.0  ;;  %v847_v26 = vmul.f32 0.01, %v769_v21  ;;  %vm845_vm5 = vcmp.ge.f32.partialorder %v840_v23, 0.0  ;;  %v849_v27 = vmul.f32 0.01, %v840_v23 }
 0x18e   :  { %v850_v28 = vsel %vm842_vm2, %v767_v15, %v846_v24  ;;  %v852_v29 = vsel %vm844_vm3, %v838_v16, %v848_v25  ;;  %v643_v13 = vmax.f32 %v635_v11, 0.0  ;;  %v2325_v16 = vld [vmem:[#allocation10 + $0x10] sm:$0xff]   ;;  %v2326_v17 = vld [vmem:[#allocation10 + $0x18] sm:$0xff]   ;;  %v2327_v18 = vld [vmem:[#allocation10 + $0x20] sm:$0xff]  }
 0x18f   :  { %v851_v32 = vsel %vm843_vm4, %v769_v21, %v847_v26  ;;  %v853_v33 = vsel %vm845_vm5, %v840_v23, %v849_v27  ;;  %v922_v38 = vpack.c.bf16 %v850_v28, %v850_v28  ;;  %v924_v39 = vpack.c.bf16 %v852_v29, %v852_v29  ;;  %v2330_v21 = vld [vmem:[#allocation10 + $0x38] sm:$0xff]   ;;  %v2331_v23 = vld [vmem:[#allocation11] sm:$0xff]   ;;  %v2332_v24 = vld [vmem:[#allocation11 + $0x8] sm:$0xff]  }
 0x190   :  { %v923_v34 = vpack.c.bf16 %v851_v32, %v851_v32  ;;  %v925_v35 = vpack.c.bf16 %v853_v33, %v853_v33  ;;  %v856_v15 = vpack.c.bf16 %v643_v13, %v643_v13  ;;  %v2333_v25 = vld [vmem:[#allocation11 + $0x10] sm:$0xff]   ;;  %v2334_v26 = vld [vmem:[#allocation11 + $0x18] sm:$0xff]   ;;  %v2335_v27 = vld [vmem:[#allocation11 + $0x20] sm:$0xff]  }
 0x191   :  { %v2336_v28 = vld [vmem:[#allocation11 + $0x28] sm:$0xff]  }
 0x192   :  { %1214 = vmatprep.mubr.bf16.mxu0 %v923_v34  ;;  %1254 = vmatprep.mubr.bf16.mxu1 %v925_v35 }
 0x193   :  { %1215 = vmatmul.mubr.bf16.vlgmr.msra.gmra.mrb[8].mxu0 %v922_v38  ;;  %1255 = vmatmul.mubr.bf16.vlgmr.msra.gmra.mrb[8].mxu1 %v924_v39 }
 0x194   :  { %2046 = vmatpush3.bf16.msra.mxu0 %v2293_v36  ;;  %2068 = vmatpush3.bf16.msra.mxu1 %v2294_v37 }
 0x195   :  { %1486 = vmatprep.mubr.bf16.mxu0 %v855_v42  ;;  %1526 = vmatprep.mubr.bf16.mxu1 %v857_v43 }
 0x196   :  { %2047 = vmatprep.subr.bf16.mxu0 %v2295_v40  ;;  %2069 = vmatprep.subr.bf16.mxu1 %v2296_v41 }
 0x198   :  { %2048 = vmatpush3.bf16.msra.mxu0 %v2297_v44  ;;  %2070 = vmatpush3.bf16.msra.mxu1 %v2298_v46 }
 0x199   :  { %2049 = vmatprep.subr.bf16.mxu0 %v2299_v47  ;;  %2071 = vmatprep.subr.bf16.mxu1 %v2300_v48 }
 0x19c   :  { %2050 = vmatpush3.bf16.msra.mxu0 %v2301_v49  ;;  %2072 = vmatpush3.bf16.msra.mxu1 %v2302_v50 }
 0x19d   :  { %2051 = vmatprep.subr.bf16.mxu0 %v2303_v51  ;;  %2073 = vmatprep.subr.bf16.mxu1 %v2304_v52  ;;  %v1980_v52 = vld [vmem:[%s2809_s8] ss:$0 sm:$0xff] }
 0x1a0   :  { %2052 = vmatpush3.bf16.msra.mxu0 %v2305_v53  ;;  %2074 = vmatpush3.bf16.msra.mxu1 %v2306_v54 }
 0x1a1   :  { %2053 = vmatprep.subr.bf16.mxu0 %v2307_v55  ;;  %2075 = vmatprep.subr.bf16.mxu1 %v2308_v56 }
 0x1a4   :  { %2054 = vmatpush3.bf16.msra.mxu0 %v2309_v59  ;;  %2076 = vmatpush3.bf16.msra.mxu1 %v2310_v60  ;;  %v2337_v59 = vld [vmem:[#allocation11 + $0x30] sm:$0xff]   ;;  %v2338_v60 = vld [vmem:[#allocation11 + $0x38] sm:$0xff]  }
 0x1a5   :  { %2055 = vmatprep.subr.bf16.mxu0 %v2311_v61  ;;  %2077 = vmatprep.subr.bf16.mxu1 %v2312_v62  ;;  %v1783_v61 = vld [vmem:[#allocation5] sm:$0x3]  ;;  %v1981_v62 = vld [vmem:[%s2811_s10] ss:$0 sm:$0xff] }
 0x1a6   :  { %1785 = vrot.lane.b32.xlu0 %v1783_v61, %s2517_s2 }
 0x1a8   :  { %2056 = vmatpush3.bf16.msra.mxu0 %v2313_v63  ;;  %2078 = vmatpush3.bf16.msra.mxu1 %v2314_v0 }
 0x1a9   :  { %2057 = vmatprep.subr.bf16.mxu0 %v2315_v6  ;;  %2079 = vmatprep.subr.bf16.mxu1 %v2316_v7 }
 0x1ac   :  { %2058 = vmatpush3.bf16.msra.mxu0 %v2317_v8  ;;  %2080 = vmatpush3.bf16.msra.mxu1 %v2318_v9 }
 0x1ad   :  { %2059 = vmatprep.subr.bf16.mxu0 %v2319_v12  ;;  %2081 = vmatprep.subr.bf16.mxu1 %v2320_v3 }
 0x1b0   :  { %2060 = vmatpush3.bf16.msra.mxu0 %v2321_v45  ;;  %2082 = vmatpush3.bf16.msra.mxu1 %v2322_v2 }
 0x1b1   :  { %2107 = vmatprep.subr.bf16.mxu0 %v2527_v22  ;;  %2127 = vmatprep.subr.bf16.mxu1 %v2527_v22 }
 0x1b3   :  { %1487 = vmatmul.mubr.bf16.vlgmr.msra.gmra.mrb[12].mxu0 %v854_v14  ;;  %1527 = vmatmul.mubr.bf16.vlgmr.msra.gmra.mrb[12].mxu1 %v856_v15 }
 0x1b4   :  { %2108 = vmatpush3.bf16.msra.mxu0 %v2323_v57  ;;  %2123 = vmatprep.mubr.msk.bf16.mxu0 %vm2528_vm6, %v2527_v22 }
 0x1b5   :  { %2109 = vmatprep.subr.bf16.mxu0 %v2527_v22  ;;  %2143 = vmatprep.mubr.msk.bf16.mxu1 %vm2528_vm6, %v2527_v22 }
 0x1b6   :  { %2128 = vmatpush3.bf16.msra.mxu1 %v2331_v23 }
 0x1b7   :  { %2129 = vmatprep.subr.bf16.mxu1 %v2527_v22 }
 0x1b8   :  { %2110 = vmatpush3.bf16.msra.mxu0 %v2324_v58 }
 0x1b9   :  { %2111 = vmatprep.subr.bf16.mxu0 %v2527_v22 }
 0x1ba   :  { %2130 = vmatpush3.bf16.msra.mxu1 %v2332_v24 }
 0x1bb   :  { %2131 = vmatprep.subr.bf16.mxu1 %v2527_v22 }
 0x1bc   :  { %2112 = vmatpush3.bf16.msra.mxu0 %v2325_v16 }
 0x1bd   :  { %2113 = vmatprep.subr.bf16.mxu0 %v2527_v22 }
 0x1be   :  { %2132 = vmatpush3.bf16.msra.mxu1 %v2333_v25 }
 0x1bf   :  { %2133 = vmatprep.subr.bf16.mxu1 %v2527_v22 }
 0x1c0   :  { %2114 = vmatpush3.bf16.msra.mxu0 %v2326_v17 }
 0x1c1   :  { %2115 = vmatprep.subr.bf16.mxu0 %v2527_v22 }
 0x1c2   :  { %2134 = vmatpush3.bf16.msra.mxu1 %v2334_v26 }
 0x1c3   :  { %2135 = vmatprep.subr.bf16.mxu1 %v2527_v22 }
 0x1c4   :  { %2116 = vmatpush3.bf16.msra.mxu0 %v2327_v18 }
 0x1c5   :  { %2117 = vmatprep.subr.bf16.mxu0 %v2527_v22 }
 0x1c6   :  { %2136 = vmatpush3.bf16.msra.mxu1 %v2335_v27 }
 0x1c7   :  { %2137 = vmatprep.subr.bf16.mxu1 %v2527_v22 }
 0x1c8   :  { %2118 = vmatpush3.bf16.msra.mxu0 %v2328_v19 }
 0x1c9   :  { %2119 = vmatprep.subr.bf16.mxu0 %v2527_v22 }
 0x1ca   :  { %2138 = vmatpush3.bf16.msra.mxu1 %v2336_v28 }
 0x1cb   :  { %2139 = vmatprep.subr.bf16.mxu1 %v2527_v22 }
 0x1cc   :  { %2120 = vmatpush3.bf16.msra.mxu0 %v2329_v20 }
 0x1cd   :  { %2121 = vmatprep.subr.bf16.mxu0 %v2527_v22 }
 0x1ce   :  { %2140 = vmatpush3.bf16.msra.mxu1 %v2337_v59 }
 0x1cf   :  { %2141 = vmatprep.subr.bf16.mxu1 %v2527_v22  ;;  %v1990_v22 = vld [vmem:[%s2813_s12] ss:$0 sm:$0xff] }
 0x1d0   :  { %2122 = vmatpush3.bf16.msra.mxu0 %v2330_v21 }
 0x1d2   :  { %2142 = vmatpush3.bf16.msra.mxu1 %v2338_v60 }
 0x218   :  { %v1786_v20 = vpop.permute.xlu0 %1785 }
 0x266   :  { %v2017_v29 = vpop.f32.mrb[8].mxu0  ;;  %v2039_v30 = vpop.f32.mrb[8].mxu1 }
 0x267   :  { %v2018_v31 = vpop.f32.mrb[9].mxu0  ;;  %v2040_v32 = vpop.f32.mrb[9].mxu1 }
 0x268   :  { %v2019_v33 = vadd.f32 %v2018_v31, %v2017_v29  ;;  %v2041_v34 = vadd.f32 %v2040_v32, %v2039_v30  ;;  %v2020_v35 = vpop.f32.mrb[10].mxu0  ;;  %v2042_v36 = vpop.f32.mrb[10].mxu1 }
 0x269   :  { %v2021_v37 = vpop.f32.mrb[11].mxu0  ;;  %v2043_v38 = vpop.f32.mrb[11].mxu1 }
 0x26a   :  { %v1257_v39 = vadd.f32 %v2041_v34, %v2019_v33  ;;  %v1794_v34 = vmul.f32 -0.5, %v1783_v61 }
 0x26c   :  { %v1795_v35 = vmul.f32 %v1794_v34, %v1783_v61 }
 0x286   :  { %v2061_v40 = vpop.f32.mrb[12].mxu0  ;;  %v2083_v41 = vpop.f32.mrb[12].mxu1 }
 0x287   :  { %v2062_v42 = vpop.f32.mrb[13].mxu0  ;;  %v2084_v43 = vpop.f32.mrb[13].mxu1 }
 0x288   :  { %v2063_v44 = vadd.f32 %v2062_v42, %v2061_v40  ;;  %v2085_v46 = vadd.f32 %v2084_v43, %v2083_v41  ;;  %v2064_v47 = vpop.f32.mrb[14].mxu0  ;;  %v2086_v48 = vpop.f32.mrb[14].mxu1  ;;  %v2000_v42 = vld [vmem:[%s2814_s13] ss:$0 sm:$0xff] }
 0x289   :  { %v2065_v49 = vpop.f32.mrb[15].mxu0  ;;  %v2087_v50 = vpop.f32.mrb[15].mxu1 }
 0x28a   :  { %v1489_v51 = vadd.f32 %v2063_v44, %v1257_v39 }
 0x28c   :  { %v1529_v53 = vadd.f32 %v2085_v46, %v1489_v51 }
 0x28e   :  { %v1541_v54 = vadd.f32 %v1980_v52, %v1529_v53 }
 0x290   :  { %v1542_v55 = vmax.f32 %v1541_v54, 0.0 }
 0x292   :  { %v1543_v56 = vpack.c.bf16 %v1542_v55, %v1542_v55 }
 0x294   :  { %2124 = vmatmul.mubr.bf16.vlgmr.msra.gmra.mrb[16].mxu0 %v1543_v56 }
 0x367   :  { %v1649_v63 = vpop.f32.mrb[16].mxu0 }
 0x368   :  { %v1650_v0 = vadd.f32 %v1981_v62, %v1649_v63  ;;  %v2125_v1 = vpop.f32.mrb[17].mxu0 }
 0x369   :  { %v1652_v5 = vpop.f32.mrb[18].mxu0 }
 0x36a   :  { %v1655_v6 = vmax.f32 %v1650_v0, 0.0  ;;  %v2126_v7 = vpop.f32.mrb[19].mxu0 }
 0x36c   :  { %v1656_v8 = vpack.c.bf16 %v1655_v6, %v1655_v6 }
 0x36e   :  { %2144 = vmatmul.mubr.bf16.vlgmr.msra.gmra.mrb[16].mxu1 %v1656_v8 }
 0x441   :  { %v1762_v9 = vpop.f32.mrb[16].mxu1 }
 0x442   :  { %v1763_v10 = vadd.f32 %v1990_v22, %v1762_v9  ;;  %v2145_v11 = vpop.f32.mrb[17].mxu1 }
 0x443   :  { %v1765_v12 = vpop.f32.mrb[18].mxu1 }
 0x444   :  { %v1769_v3 = vand.u32 2147483647, %v1763_v10  ;;  %v2146_v45 = vpop.f32.mrb[19].mxu1  ;;  %v1768_v19 = vmax.f32 %v1763_v10, 0.0 }
 0x446   :  { %v1770_v2 = vsub.f32 0.0, %v1769_v3 }
 0x448   :  { %v1771_v4 = vmul.f32 1.442695, %v1770_v2 }
 0x44a   :  { %2339 = vpow2.f32 %v1771_v4 }
 0x454   :  { %v2340_v13 = vpop.eup %2339 }
 0x455   :  { %v1773_v14 = vadd.f32 1.0, %v2340_v13  ;;  %v1776_v15 = vmul.f32 -0.5, %v2340_v13  ;;  %v1779_v58 = vand.u32 2147483647, %v2340_v13 }
 0x457   :  { %2341 = vlog2.f32 %v1773_v14  ;;  %v1777_v57 = vadd.f32 1.0, %v1776_v15  ;;  %vm1780_vm7 = vcmp.lt.f32.partialorder %v1779_v58, 0.0004427343 }
 0x459   :  { %v1778_v18 = vmul.f32 %v2340_v13, %v1777_v57 }
 0x461   :  { %v2342_v16 = vpop.eup %2341 }
 0x462   :  { %v1775_v17 = vmul.f32 0.6931472, %v2342_v16 }
 0x464   :  { %v1781_v21 = vsel %vm1780_vm7, %v1778_v18, %v1775_v17 }
 0x465   :  { %v1782_v23 = vadd.f32 %v1781_v21, %v1768_v19 }
 0x467   :  { %v1788_v24 = vmul.f32 %v1786_v20, %v1782_v23  ;;  %2343 = vlog2.f32 %v1782_v23 }
 0x469   :  { %1790 = vrot.lane.b32.xlu0 %v1788_v24, %s2517_s2 }
 0x471   :  { %v2344_v25 = vpop.eup %2343 }
 0x472   :  { %v1797_v26 = vmul.f32 0.6931472, %v2344_v25 }
 0x474   :  { %1799 = vrot.lane.b32.xlu1 %v1797_v26, %s2517_s2 }
 0x4db   :  { %v1791_v27 = vpop.permute.xlu0 %1790 }
 0x4dc   :  { %v1793_v28 = vadd.f32 %v1791_v27, %v1763_v10 }
 0x4de   :  { %2345 = vtanh.f32 %v1793_v28 }
 0x4e6   :  { %v1800_v36 = vpop.permute.xlu1 %1799 }
 0x4e7   :  { %v1802_v37 = vsub.f32 %v1795_v35, %v1800_v36 }
 0x4e8   :  { %v2346_v29 = vpop.eup %2345 }
 0x4e9   :  { %2347 = vtanh.f32 %v2346_v29  ;;  %v1999_v39 = vadd.f32 -0.9189385, %v1802_v37  ;;  %v1819_v43 = vmul.f32 %v2346_v29, %v2000_v42 }
 0x4f3   :  { %v2348_v30 = vpop.eup %2347 }
 0x4f4   :  { %v1806_v31 = vmul.f32 %v2348_v30, %v2348_v30 }
 0x4f6   :  { %v1807_v32 = vsub.f32 1.0, %v1806_v31 }
 0x4f8   :  { %v1808_v33 = vadd.f32 1e-07, %v1807_v32 }
 0x4fa   :  { %2349 = vlog2.f32 %v1808_v33 }
 0x504   :  { %v2350_v38 = vpop.eup %2349 }
 0x505   :  { %v1810_v40 = vmul.f32 0.6931472, %v2350_v38 }
 0x507   :  { %v1811_v41 = vsub.f32 %v1999_v39, %v1810_v40 }
 0x509   :  { %1821 = vrot.lane.b32.xlu1 %v1811_v41, %s2517_s2 }
 0x57b   :  { %v1822_v44 = vpop.permute.xlu1 %1821 }
 0x57c   :  { %v1825_v46 = vsel %vm1824_vm8, %v1819_v43, %v1822_v44 }
 0x57d   :  { %1826 = vst [vmem:[#allocation13] sm:$0x3] %v1825_v46 }
 0x57e   :  { %2494 = shalt.err (!%p2491_p10)
}
 0x57f   :  { %s2495_s17 = scalar_lea.hbm %s2815_s14, 32 }
 0x580   :  { %p2496_p11 = scmp.ne.s32.totalorder %s2815_s14, %s2495_s17  ;;  %p2499_p12 = scmp.lt.u32.totalorder %s2495_s17, %s2815_s14 }
 0x582   :  { %p2501_p13 = pnand %p2499_p12, %p2496_p11 }
 0x584   :  { %2504 = shalt.err (!%p2501_p13)
}
 0x585   :  { %1836 = dma.vmem_to_hbm [thread:$0]  %s1834_s15, 32, %s2815_s14, [#allocation4]  }
 0x586   :  { %2513 = dma.done.wait [#allocation4], 32  }
 0x587   :  { %2514 = vsyncadd [#allocation4], 4294967264 }
 0x588   :  { %1840 = vsyncpa [#allocation3], 1 }
 0x589   :  { %1841 = vsyncpa [#allocation6], 1 }
 0x58a   :  { %1842 = vsyncpa [#allocation9], 1 }
 0x58b   :  { %1843 = vsyncpa [#allocation12], 1 }
 0x58c   :  { %1844 = vsyncpa [#allocation4], 1 }

</bundles_post_ra>
